<compile_context>
chip_gen: v7x
topology: tpu7x:2x2x1
jax: 0.10.0
libtpu: 0.0.40
codegen_flags: <defaults>
</compile_context>

<pallas_src>
import jax
import jax.numpy as jnp
from jax.experimental import pallas as pl
from jax.experimental.pallas import tpu as pltpu

IN_FEATURES = 18
OUT_FEATURES = 2
MAX_PACK = 7              # 7 * 18 = 126 <= 128 lanes
TILE_BATCH_MAX = 8192     # target batch elements per grid step
TILE_ROWS_HARD_MAX = 2048 # keeps double-buffered in/out blocks ~4 MiB on every gen
MIN_GRID_STEPS = 8        # keep several steps for v7x megacore + pipelining


def _cdiv(a, b):
    return -(-a // b)


def _pack_factor(batch):
    """Largest R in [1, 7] that divides the batch (so the reshape is free)."""
    for r in range(MAX_PACK, 0, -1):
        if batch % r == 0:
            return r
    return 1


def mlp_kernel(w_ref, b_ref, x_ref, o_ref):
    # w_ref: (18R, 2R) block-diagonal folded weight, VMEM-resident across tiles
    # b_ref: (1, 2R)   folded bias (sublane-broadcast add)
    # x_ref: (tile_rows, 18R) packed activation tile (R batch rows per kernel row)
    # o_ref: (tile_rows, 2R)  packed output tile
    acc = jnp.dot(x_ref[...], w_ref[...], preferred_element_type=jnp.float32)
    o_ref[...] = jnp.maximum(acc + b_ref[...], 0.0)


def mlp_forward(x, params, *, stream_bf16=False):
    """x: shape (B, ...) flattening to (B, 18). Returns (B, 2) float32."""
    w1, b1, w2, b2, w3, b3 = params
    B = x.shape[0]
    x_flat = jnp.reshape(x, (B, -1))
    assert x_flat.shape[1] == IN_FEATURES, f"expected 18 features, got {x_flat.shape[1]}"

    # Reference does `.float()`.  bf16 streaming is opt-in (not bit-faithful);
    # if x is already bf16 upstream this cast is a no-op, not an extra pass.
    compute_dtype = jnp.bfloat16 if stream_bf16 else jnp.float32
    x_flat = x_flat.astype(compute_dtype)

    # --- fold the 3 affine layers into one (exact; no activation in between) --
    wc = (w1 @ w2 @ w3).astype(jnp.float32)                  # (18, 2)
    bc = (((b1 @ w2) + b2) @ w3 + b3).astype(jnp.float32)    # (1, 2)

    # --- pack R batch rows per kernel row (free, contiguous reshape) ----------
    R = _pack_factor(B)
    K = IN_FEATURES * R                                      # <= 126 lanes
    N = OUT_FEATURES * R                                     # <= 14 lanes
    rows = B // R
    x_packed = jnp.reshape(x_flat, (rows, K))                # no copy (row-major)
    w_big = jnp.kron(jnp.eye(R, dtype=jnp.float32), wc).astype(compute_dtype)  # (K, N)
    b_big = jnp.tile(bc, (1, R))                             # (1, N) float32

    # --- tile & grid selection ------------------------------------------------
    if rows < 8:
        tile_rows = rows                                     # block == full dims
    else:
        tile_rows_cap = min(TILE_ROWS_HARD_MAX,
                            max(8, (TILE_BATCH_MAX // R) // 8 * 8))
        tile_rows = max(8, min(tile_rows_cap, (rows // MIN_GRID_STEPS) // 8 * 8))
    grid = (_cdiv(rows, tile_rows),)                         # ragged tail: masked stores

    out_packed = pl.pallas_call(
        mlp_kernel,
        out_shape=jax.ShapeDtypeStruct((rows, N), jnp.float32),
        grid=grid,
        in_specs=[
            pl.BlockSpec((K, N), lambda i: (0, 0)),          # folded weight (resident)
            pl.BlockSpec((1, N), lambda i: (0, 0)),          # folded bias   (resident)
            pl.BlockSpec((tile_rows, K), lambda i: (i, 0)),  # streamed activations
        ],
        out_specs=pl.BlockSpec((tile_rows, N), lambda i: (i, 0)),
        compiler_params=pltpu.CompilerParams(
            dimension_semantics=("parallel",),
        ),
    )(w_big, b_big, x_packed)

    # Free contiguous reshape back to (B, 2); no slicing / transpose needed.
    return jnp.reshape(out_packed, (B, OUT_FEATURES))


def init_params(key):
    """Deterministic init mirroring nn.Linear shapes (weights stored (in, out))."""
    ks = jax.random.split(key, 6)

    def lin(kw, kb, fan_in, fan_out):
        bound = 1.0 / jnp.sqrt(fan_in)
        w = jax.random.uniform(kw, (fan_in, fan_out), jnp.float32, -bound, bound)
        b = jax.random.uniform(kb, (1, fan_out), jnp.float32, -bound, bound)
        return w, b

    w1, b1 = lin(ks[0], ks[1], 18, 18)
    w2, b2 = lin(ks[2], ks[3], 18, 9)
    w3, b3 = lin(ks[4], ks[5], 9, 2)
    return (w1, b1, w2, b2, w3, b3)


def mlp_reference(x, params):
    w1, b1, w2, b2, w3, b3 = params
    B = x.shape[0]
    h = jnp.reshape(x, (B, -1)).astype(jnp.float32)
    h = h @ w1 + b1
    h = h @ w2 + b2
    h = h @ w3 + b3
    return jnp.maximum(h, 0.0)


if __name__ == "__main__":
    key = jax.random.PRNGKey(0)
    k_param, k_x = jax.random.split(key)
    params = init_params(k_param)

    # Input: batch=2, features flatten to 18 (e.g. (2, 3, 6)), as the module implies.
    x = jax.random.normal(k_x, (2, 3, 6), dtype=jnp.float32)
    out = jax.block_until_ready(mlp_forward(x, params))
    ref = mlp_reference(x, params)
    assert out.shape == (2, 2) and out.dtype == jnp.float32
    assert jnp.allclose(out, ref, atol=1e-5, rtol=1e-5), "mismatch vs reference"

    # Extra shape checks: packed path with a ragged grid tail (B=70 -> R=7) and
    # the R=1 fallback for a prime batch (B=37, masked boundary block).
    for b_extra in (70, 37):
        x_e = jax.random.normal(jax.random.PRNGKey(b_extra), (b_extra, 18), jnp.float32)
        out_e = jax.block_until_ready(mlp_forward(x_e, params))
        ref_e = mlp_reference(x_e, params)
        assert out_e.shape == (b_extra, 2)
        assert jnp.allclose(out_e, ref_e, atol=1e-5, rtol=1e-5), f"mismatch at B={b_extra}"

    print("KERNEL_OK")
</pallas_src>

<mosaic_0001>
module attributes {stable_mosaic.version = 11 : i64} {
  func.func @mlp_kernel(%arg0: i32, %arg1: memref<36x4xf32, #tpu.memory_space<vmem>>, %arg2: memref<1x4xf32, #tpu.memory_space<vmem>>, %arg3: memref<1x36xf32, #tpu.memory_space<vmem>>, %arg4: memref<1x4xf32, #tpu.memory_space<vmem>>) attributes {dimension_semantics = [#tpu.dimension_semantics<parallel>], iteration_bounds = array<i64: 1>, scalar_prefetch = 0 : i64, scratch_operands = 0 : i64, tpu.core_type = #tpu.core_type<tc>, window_params = [{pipeline_mode = #tpu.pipeline_mode<synchronous>, transform_indices = @transform_0, window_bounds = array<i64: 36, 4>}, {pipeline_mode = #tpu.pipeline_mode<synchronous>, transform_indices = @transform_1, window_bounds = array<i64: 1, 4>}, {transform_indices = @transform_2, window_bounds = array<i64: 1, 36>}, {transform_indices = @transform_3, window_bounds = array<i64: 1, 4>}]} {
    %c0 = arith.constant 0 : index
    %c0_0 = arith.constant 0 : index
    %0 = vector.load %arg3[%c0, %c0_0] : memref<1x36xf32, #tpu.memory_space<vmem>>, vector<1x36xf32>
    %c0_1 = arith.constant 0 : index
    %c0_2 = arith.constant 0 : index
    %1 = vector.load %arg1[%c0_1, %c0_2] : memref<36x4xf32, #tpu.memory_space<vmem>>, vector<36x4xf32>
    %cst = arith.constant dense<0.000000e+00> : vector<1x4xf32>
    %2 = tpu.matmul %0, %1, %cst {dimension_numbers = #tpu.dot_dimension_numbers<[1], [0], [0], [1], [0, 0, 1, 1], [], []>} : vector<1x36xf32>, vector<36x4xf32>, vector<1x4xf32> -> vector<1x4xf32>
    %c0_3 = arith.constant 0 : index
    %c0_4 = arith.constant 0 : index
    %3 = vector.load %arg2[%c0_3, %c0_4] : memref<1x4xf32, #tpu.memory_space<vmem>>, vector<1x4xf32>
    %4 = arith.addf %2, %3 : vector<1x4xf32>
    %cst_5 = arith.constant 0.000000e+00 : f32
    %5 = vector.broadcast %cst_5 : f32 to vector<1x4xf32>
    %6 = arith.maximumf %4, %5 : vector<1x4xf32>
    %c0_6 = arith.constant 0 : index
    %c0_7 = arith.constant 0 : index
    %7 = vector.load %arg4[%c0_6, %c0_7] : memref<1x4xf32, #tpu.memory_space<vmem>>, vector<1x4xf32>
    tpu.vector_store %arg4[%c0_6, %c0_7], %6 {strides = array<i32>} : memref<1x4xf32, #tpu.memory_space<vmem>>, vector<1x4xf32>,
    return
  }
  func.func @transform_0(%arg0: i32) -> (i32, i32) {
    %c0_i32 = arith.constant 0 : i32
    %c0_i32_0 = arith.constant 0 : i32
    %c0_i32_1 = arith.constant 0 : i32
    return %c0_i32, %c0_i32_0 : i32, i32
  }
  func.func @transform_1(%arg0: i32) -> (i32, i32) {
    %c0_i32 = arith.constant 0 : i32
    %c0_i32_0 = arith.constant 0 : i32
    %c0_i32_1 = arith.constant 0 : i32
    return %c0_i32, %c0_i32_0 : i32, i32
  }
  func.func @transform_2(%arg0: i32) -> (i32, i32) {
    %c0_i32 = arith.constant 0 : i32
    %c0_i32_0 = arith.constant 0 : i32
    return %arg0, %c0_i32 : i32, i32
  }
  func.func @transform_3(%arg0: i32) -> (i32, i32) {
    %c0_i32 = arith.constant 0 : i32
    %c0_i32_0 = arith.constant 0 : i32
    return %arg0, %c0_i32 : i32, i32
  }
}

</mosaic_0001>

<bundles_post_ra>
// kernel: tpu_custom_call.1
= control target key start
LH: loop header
LB: loop body
LE: loop exit
PB: predicated region body
PF: predicated region fallthrough
CT: control target
= control target key end

     0   :  { %v172_v3 = vmov 0.0|0.0   ;;  %vm173_vm0 = vmmov 0   ;;  %v174_v6 = vmov 0.0   ;;  %s229_s0 = inlined_call_operand.vmem [shape: f32[36,4], index: 0, kind: input, shape index: {}]   ;;  %s230_s1 = inlined_call_operand.vmem [shape: f32[1,4], index: 1, kind: input, shape index: {}]   ;;  %s231_s2 = inlined_call_operand.vmem [shape: f32[1,36], index: 2, kind: input, shape index: {}]   ;;  %s232_s3 = inlined_call_operand.hbm [shape: f32[1,4], index: 3, kind: output, shape index: {}]  }
   0x1   :  { %v16_v0 = vld [vmem:[%s229_s0] sm:$0xff]  ;;  %v17_v1 = vld [vmem:[%s229_s0 + $0x8] sm:$0xff]  ;;  %v18_v2 = vld [vmem:[%s229_s0 + $0x10] sm:$0xff]  ;;  %138 = vmatprep.subr.bf16.mxu0 %v172_v3  ;;  %135 = vmatprep.mubr.msk.f32.mxu0 %vm173_vm0, %v174_v6 }
   0x2   :  { %v139_v4 = vpack.c.bf16 %v17_v1, %v16_v0  ;;  %v19_v5 = vld [vmem:[%s229_s0 + $0x18] sm:$0xff] }
   0x3   :  { %8 = vsyncpa [#allocation3], 0  ;;  %v142_v7 = vpack.c.bf16 %v19_v5, %v18_v2  ;;  %v20_v8 = vld [vmem:[%s229_s0 + $0x20] sm:$0xf]  ;;  %vm26_vm1 = vcmask 1043456   ;;  %vm22_vm2 = vcmask 293888  }
   0x4   :  { %140 = vmatpush3.bf16.msra.mxu0 %v139_v4  ;;  %v15_v9 = vld [vmem:[%s231_s2] sm:$0x1]  ;;  %s175_s26 = smov [#allocation2]   ;;  %vm101_vm3 = vcmask 24576  }
   0x5   :  { %141 = vmatprep.subr.bf16.mxu0 %v172_v3  ;;  %v21_v10 = vld [vmem:[%s230_s1] sm:$0x1]  ;;  %s109_s27 = sshll.u32 %s175_s26, 4  ;;  %s110_s27 = int_to_ptr.vmem [resolvable:$true] %s109_s27 }
   0x6   :  { %s148_s0 = scalar_lea.vmem %s110_s27, 16  ;;  %s152_s28 = scalar_lea.vmem %s110_s27, 32 }
   0x7   :  { %p149_p0 = scmp.ne.s32.totalorder %s110_s27, %s148_s0  ;;  %p153_p1 = scmp.lt.s32.totalorder %s110_s27, %s110_s27 }
   0x8   :  { %143 = vmatpush3.bf16.msra.mxu0 %v142_v7  ;;  %p154_p2 = scmp.lt.s32.totalorder %s152_s28, %s148_s0 }
   0x9   :  { %133 = vmatprep.subr.mxu0 %v174_v6 }
   0xa   :  { %p155_p3 = por %p154_p2, %p153_p1 }
   0xc   :  { %134 = vmatpush3.msk.msra.mxu0 %vm26_vm1, %v20_v8  ;;  %p156_p4 = pnand %p155_p3, %p149_p0 }
   0xd   :  { %136 = vmatmul.mubr.msk.f32.vlgmr.msra.gmra.mrb[0].mxu0 %vm22_vm2, %v15_v9 }
  0xe0   :  { %v96_v11 = vpop.f32.mrb[0].mxu0 }
  0xe1   :  { %v97_v12 = vadd.f32 %v96_v11, %v21_v10  ;;  %v137_v13 = vpop.f32.mrb[1].mxu0 }
  0xe3   :  { %v100_v14 = vmax.f32 %v97_v12, 0.0 }
  0xe5   :  { %102 = vst.msk [vmem:[#allocation2] sm:$0x1] %vm101_vm3, %v100_v14 }
  0xe6   :  { %159 = shalt.err (!%p156_p4)
}
  0xe7   :  { %s160_s1 = scalar_lea.hbm %s232_s3, 16 }
  0xe8   :  { %p161_p5 = scmp.ne.s32.totalorder %s232_s3, %s160_s1  ;;  %p164_p6 = scmp.lt.u32.totalorder %s160_s1, %s232_s3 }
  0xea   :  { %p166_p7 = pnand %p164_p6, %p161_p5 }
  0xec   :  { %169 = shalt.err (!%p166_p7)
}
  0xed   :  { %112 = dma.vmem_to_hbm [thread:$0]  %s110_s27, 16, %s232_s3, [#allocation3]  }
  0xee   :  { %170 = dma.done.wait [#allocation3], 16  }
  0xef   :  { %171 = vsyncadd [#allocation3], 4294967280 }
  0xf0   :  { %116 = vsyncpa [#allocation3], 1 }

</bundles_post_ra>
